<compile_context>
chip_gen: v6e
topology: v6e:2x2x1
jax: 0.10.0
libtpu: 0.0.40
codegen_flags: <defaults>
</compile_context>

<pallas_src>
import functools

import jax
import jax.numpy as jnp
from jax.experimental import pallas as pl
from jax.experimental.pallas import tpu as pltpu


# ---------------------------------------------------------------------------
# Phase 1: global average pool over H*W  +  excite (Linear/ReLU/Linear/Sigmoid)
# ---------------------------------------------------------------------------
def _pool_gate_kernel(x_ref, w1t_ref, w2t_ref, gate_ref, pool_acc, h_acc, *,
                      inv_hw):
    c = pl.program_id(1)
    k = pl.program_id(2)
    nc = pl.num_programs(1)
    nk = pl.num_programs(2)

    @pl.when(jnp.logical_and(c == 0, k == 0))
    def _():
        h_acc[...] = jnp.zeros_like(h_acc)          # (Bt, C_red) f32

    @pl.when(k == 0)
    def _():
        pool_acc[...] = jnp.zeros_like(pool_acc)    # (Bt, Ct) f32

    # x block: (Bt, Ct, HWt) in native dtype; accumulate channel sums in f32.
    pool_acc[...] += jnp.sum(x_ref[...].astype(jnp.float32), axis=-1)

    @pl.when(k == nk - 1)
    def _():
        # Fold this channel tile's pooled means through the first linear,
        # so the full (Bt, C) pooled vector never needs to exist at once.
        pooled = pool_acc[...] * inv_hw                                # (Bt, Ct)
        h_acc[...] += jnp.dot(pooled, w1t_ref[...],
                              preferred_element_type=jnp.float32)      # (Bt, Cr)

    @pl.when(jnp.logical_and(c == nc - 1, k == nk - 1))
    def _():
        h = jnp.maximum(h_acc[...], 0.0)                               # ReLU
        g = jax.nn.sigmoid(jnp.dot(h, w2t_ref[...],
                                   preferred_element_type=jnp.float32))  # (Bt, C)
        # Lane-dense gate block (Bt, 1, C): write one full-lane row per batch
        # element (static unrolled loop, Bt is capped small) - no relayout,
        # no masked trailing-dim stores.
        for r in range(gate_ref.shape[0]):
            gate_ref[r, :, :] = g[r:r + 1, :]


# ---------------------------------------------------------------------------
# Phase 2: per-channel scale, native-dtype streaming, fully parallel grid
# ---------------------------------------------------------------------------
def _scale_kernel(x_ref, gate_ref, o_ref):
    gate = gate_ref[...]                                   # (Bt, Ct, 1) f32
    # Multiply in f32 so the gate is rounded only once, at the final store.
    o_ref[...] = (x_ref[...].astype(jnp.float32) * gate).astype(o_ref.dtype)


# ---------------------------------------------------------------------------
# Hardware / tile-size heuristics
# ---------------------------------------------------------------------------
def _tpu_vmem_capacity_bytes():
    try:
        return int(pltpu.get_tpu_info().vmem_capacity_bytes)
    except Exception:
        return 64 * 1024 * 1024     # conservative: v7x per-TensorCore VMEM


def _pick_hw_tile(hw, target=2048):
    """Largest multiple-of-128 divisor of hw that is <= target (lane dense).

    Non-128-multiple hw (DenseNet's 49/196/784/3136) uses the full spatial
    extent and relies on channel tiling to keep blocks small."""
    if hw % 128 != 0:
        return hw
    best = 128
    for t in range(128, min(hw, target) + 1, 128):
        if hw % t == 0:
            best = t
    return best


def _pick_c_tile(c, hw_tile, itemsize, budget):
    """Channel tile: full C when the (C, hw_tile) slab fits the budget, else
    the largest multiple-of-128 divisor of C that fits.  Stepping by 128 keeps
    every dtype's packed sublane tile (8/16/32) unmasked and keeps the gate's
    lane dimension 128-aligned."""
    if c % 128 != 0 or c * hw_tile * itemsize <= budget:
        return c
    ct = min(c, max(128, (budget // (hw_tile * itemsize)) // 128 * 128))
    while c % ct != 0:
        ct -= 128
    return max(ct, 128)


def _pick_b_tile(b, per_batch_bytes, budget, *, max_tile=None):
    """Largest divisor of b whose block stays within the byte budget; keep at
    least two batch steps when b >= 2 so the leading 'parallel' axis can be
    split across both TensorCores on v7x."""
    bt = max(1, min(b, budget // max(per_batch_bytes, 1)))
    if b >= 2:
        bt = min(bt, b // 2)
    if max_tile is not None:
        bt = min(bt, max_tile)
    bt = max(bt, 1)
    while b % bt != 0:
        bt -= 1
    return bt


# ---------------------------------------------------------------------------
# Wrapper
# ---------------------------------------------------------------------------
def squeeze_excite(x, w1, w2, *, block_budget_bytes=None):
    """Squeeze-and-Excitation forward.

    x : (B, C, H, W)  NCHW, any float dtype.
    w1: (C // r, C)   first excite linear (no bias).
    w2: (C, C // r)   second excite linear (no bias).
    """
    B, C, H, W = x.shape
    HW = H * W
    itemsize = jnp.dtype(x.dtype).itemsize

    cap = _tpu_vmem_capacity_bytes()
    if block_budget_bytes is None:
        # ~8 MiB blocks on 128 MiB parts (v5e/v6e), ~4 MiB on 64 MiB v7x:
        # in + out blocks double-buffered => ~4x the budget resident.
        block_budget_bytes = (8 << 20) if cap >= (128 << 20) else (4 << 20)
    vmem_limit = int(min(cap // 2, 64 << 20))

    x2 = x.reshape(B, C, HW)
    # Pre-transpose the (tiny) weights once so in-kernel matmuls are plain
    # row-major (Bt, Ct) @ (Ct, C_red) and (Bt, C_red) @ (C_red, C).
    w1t = jnp.asarray(w1, jnp.float32).T                   # (C, C_red)
    w2t = jnp.asarray(w2, jnp.float32).T                   # (C_red, C)
    C_red = w1t.shape[1]

    hw_t = _pick_hw_tile(HW)
    c_t = _pick_c_tile(C, hw_t, itemsize, block_budget_bytes)

    # ---- Phase 1: lane-dense gate (B, 1, C) float32 ------------------------
    bt1 = _pick_b_tile(B, c_t * hw_t * itemsize, block_budget_bytes,
                       max_tile=32)   # bounds the unrolled gate-store loop
    gate = pl.pallas_call(
        functools.partial(_pool_gate_kernel, inv_hw=1.0 / float(HW)),
        out_shape=jax.ShapeDtypeStruct((B, 1, C), jnp.float32),
        grid_spec=pltpu.PrefetchScalarGridSpec(
            num_scalar_prefetch=0,
            grid=(B // bt1, C // c_t, HW // hw_t),
            in_specs=[
                pl.BlockSpec((bt1, c_t, hw_t), lambda b, c, k: (b, c, k)),
                pl.BlockSpec((c_t, C_red), lambda b, c, k: (c, 0)),
                pl.BlockSpec((C_red, C), lambda b, c, k: (0, 0)),
            ],
            out_specs=pl.BlockSpec((bt1, 1, C), lambda b, c, k: (b, 0, 0)),
            scratch_shapes=[pltpu.VMEM((bt1, c_t), jnp.float32),
                            pltpu.VMEM((bt1, C_red), jnp.float32)],
        ),
        compiler_params=pltpu.CompilerParams(
            dimension_semantics=("parallel", "arbitrary", "arbitrary"),
            vmem_limit_bytes=vmem_limit),
    )(x2, w1t, w2t)

    # (B, 1, C) and (B, C, 1) share the same element order: this reshape is
    # metadata-only layout plumbing, not extra HBM traffic.
    gate = gate.reshape(B, C, 1)

    # ---- Phase 2: scale, native dtype, all axes parallel -------------------
    bt2 = _pick_b_tile(B, c_t * hw_t * itemsize, block_budget_bytes)
    out = pl.pallas_call(
        _scale_kernel,
        out_shape=jax.ShapeDtypeStruct((B, C, HW), x.dtype),
        grid_spec=pltpu.PrefetchScalarGridSpec(
            num_scalar_prefetch=0,
            grid=(B // bt2, C // c_t, HW // hw_t),
            in_specs=[
                pl.BlockSpec((bt2, c_t, hw_t), lambda b, c, k: (b, c, k)),
                pl.BlockSpec((bt2, c_t, 1), lambda b, c, k: (b, c, 0)),
            ],
            out_specs=pl.BlockSpec((bt2, c_t, hw_t), lambda b, c, k: (b, c, k)),
        ),
        compiler_params=pltpu.CompilerParams(
            dimension_semantics=("parallel", "parallel", "parallel"),
            vmem_limit_bytes=vmem_limit),
    )(x2, gate)

    return out.reshape(B, C, H, W)


# ---------------------------------------------------------------------------
# Pure-JAX reference (matches the PyTorch forward)
# ---------------------------------------------------------------------------
def _reference(x, w1, w2):
    xf = x.astype(jnp.float32)
    pooled = jnp.mean(xf, axis=(2, 3))                                  # (B, C)
    h = jnp.maximum(jnp.dot(pooled, w1.astype(jnp.float32).T,
                            precision=jax.lax.Precision.HIGHEST), 0.0)  # (B, Cr)
    g = jax.nn.sigmoid(jnp.dot(h, w2.astype(jnp.float32).T,
                               precision=jax.lax.Precision.HIGHEST))    # (B, C)
    return (xf * g[:, :, None, None]).astype(x.dtype)


if __name__ == "__main__":
    key = jax.random.PRNGKey(0)

    # Case 1: tiny smoke test (HW a multiple of 128, no channel tiling).
    k1, k2, k3, key = jax.random.split(key, 4)
    B, C, H, W, red = 2, 4, 16, 16, 2
    x = jax.random.normal(k1, (B, C, H, W), dtype=jnp.float32)
    w1 = jax.random.normal(k2, (C // red, C), dtype=jnp.float32) * 0.5
    w2 = jax.random.normal(k3, (C, C // red), dtype=jnp.float32) * 0.5
    out = jax.block_until_ready(squeeze_excite(x, w1, w2))
    ref = _reference(x, w1, w2)
    assert out.shape == x.shape
    assert jnp.allclose(out, ref, atol=1e-4, rtol=1e-4), "case 1 mismatch"

    # Case 2: DenseNet-style spatial size (HW = 49, not a multiple of 128)
    # with a tiny block budget to force the channel-tiled Phase-1 path.
    k1, k2, k3, key = jax.random.split(key, 4)
    B, C, H, W, red = 2, 256, 7, 7, 16
    x = jax.random.normal(k1, (B, C, H, W), dtype=jnp.float32)
    w1 = jax.random.normal(k2, (C // red, C), dtype=jnp.float32) * 0.1
    w2 = jax.random.normal(k3, (C, C // red), dtype=jnp.float32) * 0.1
    out = jax.block_until_ready(
        squeeze_excite(x, w1, w2, block_budget_bytes=32 * 1024))
    ref = _reference(x, w1, w2)
    assert out.shape == x.shape
    assert jnp.allclose(out, ref, atol=2e-4, rtol=2e-4), "case 2 mismatch"

    print("KERNEL_OK")
</pallas_src>

<mosaic_0001>
module attributes {stable_mosaic.version = 11 : i64} {
  func.func @_pool_gate_kernel(%arg0: i32, %arg1: i32, %arg2: i32, %arg3: memref<1x4x256xf32, #tpu.memory_space<vmem>>, %arg4: memref<4x2xf32, #tpu.memory_space<vmem>>, %arg5: memref<2x4xf32, #tpu.memory_space<vmem>>, %arg6: memref<1x1x4xf32, #tpu.memory_space<vmem>>, %arg7: memref<1x4xf32, #tpu.memory_space<vmem>>, %arg8: memref<1x2xf32, #tpu.memory_space<vmem>>) attributes {dimension_semantics = [#tpu.dimension_semantics<parallel>, #tpu.dimension_semantics<arbitrary>, #tpu.dimension_semantics<arbitrary>], iteration_bounds = array<i64: 2, 1, 1>, scalar_prefetch = 0 : i64, scratch_operands = 2 : i64, tpu.core_type = #tpu.core_type<tc>, window_params = [{transform_indices = @transform_0, window_bounds = array<i64: 1, 4, 256>}, {transform_indices = @transform_1, window_bounds = array<i64: 4, 2>}, {pipeline_mode = #tpu.pipeline_mode<synchronous>, transform_indices = @transform_2, window_bounds = array<i64: 2, 4>}, {transform_indices = @transform_3, window_bounds = array<i64: 1, 1, 4>}]} {
    %c0_i32 = arith.constant 0 : i32
    %0 = arith.cmpi eq, %arg1, %c0_i32 : i32
    %c0_i32_0 = arith.constant 0 : i32
    %1 = arith.cmpi eq, %arg2, %c0_i32_0 : i32
    %2 = arith.andi %0, %1 : i1
    %3 = arith.extui %2 : i1 to i32
    %c0_i32_1 = arith.constant 0 : i32
    %4 = arith.cmpi ne, %3, %c0_i32_1 : i32
    scf.if %4 {
      %cst_15 = arith.constant 0.000000e+00 : f32
      %21 = vector.broadcast %cst_15 : f32 to vector<1x2xf32>
      %c0_16 = arith.constant 0 : index
      %c0_17 = arith.constant 0 : index
      %22 = vector.load %arg8[%c0_16, %c0_17] : memref<1x2xf32, #tpu.memory_space<vmem>>, vector<1x2xf32>
      tpu.vector_store %arg8[%c0_16, %c0_17], %21 {strides = array<i32>} : memref<1x2xf32, #tpu.memory_space<vmem>>, vector<1x2xf32>,
    } else {
    }
    %c0_i32_2 = arith.constant 0 : i32
    %5 = arith.cmpi eq, %arg2, %c0_i32_2 : i32
    %6 = arith.extui %5 : i1 to i32
    %c0_i32_3 = arith.constant 0 : i32
    %7 = arith.cmpi ne, %6, %c0_i32_3 : i32
    scf.if %7 {
      %cst_15 = arith.constant 0.000000e+00 : f32
      %21 = vector.broadcast %cst_15 : f32 to vector<1x4xf32>
      %c0_16 = arith.constant 0 : index
      %c0_17 = arith.constant 0 : index
      %22 = vector.load %arg7[%c0_16, %c0_17] : memref<1x4xf32, #tpu.memory_space<vmem>>, vector<1x4xf32>
      tpu.vector_store %arg7[%c0_16, %c0_17], %21 {strides = array<i32>} : memref<1x4xf32, #tpu.memory_space<vmem>>, vector<1x4xf32>,
    } else {
    }
    %c0 = arith.constant 0 : index
    %c0_4 = arith.constant 0 : index
    %8 = vector.load %arg7[%c0, %c0_4] : memref<1x4xf32, #tpu.memory_space<vmem>>, vector<1x4xf32>
    %c0_5 = arith.constant 0 : index
    %c0_6 = arith.constant 0 : index
    %c0_7 = arith.constant 0 : index
    %9 = vector.load %arg3[%c0_5, %c0_6, %c0_7] : memref<1x4x256xf32, #tpu.memory_space<vmem>>, vector<1x4x256xf32>
    %cst = arith.constant dense<0.000000e+00> : vector<1x4xf32>
    %10 = vector.multi_reduction <add>, %9, %cst [2] : vector<1x4x256xf32> to vector<1x4xf32>
    %11 = arith.addf %8, %10 : vector<1x4xf32>
    %c0_8 = arith.constant 0 : index
    %c0_9 = arith.constant 0 : index
    %12 = vector.load %arg7[%c0_8, %c0_9] : memref<1x4xf32, #tpu.memory_space<vmem>>, vector<1x4xf32>
    tpu.vector_store %arg7[%c0_8, %c0_9], %11 {strides = array<i32>} : memref<1x4xf32, #tpu.memory_space<vmem>>, vector<1x4xf32>,
    %c0_i32_10 = arith.constant 0 : i32
    %13 = arith.cmpi eq, %arg2, %c0_i32_10 : i32
    %14 = arith.extui %13 : i1 to i32
    %c0_i32_11 = arith.constant 0 : i32
    %15 = arith.cmpi ne, %14, %c0_i32_11 : i32
    scf.if %15 {
      %c0_15 = arith.constant 0 : index
      %c0_16 = arith.constant 0 : index
      %21 = vector.load %arg7[%c0_15, %c0_16] : memref<1x4xf32, #tpu.memory_space<vmem>>, vector<1x4xf32>
      %cst_17 = arith.constant 3.906250e-03 : f32
      %22 = vector.broadcast %cst_17 : f32 to vector<1x4xf32>
      %23 = arith.mulf %21, %22 : vector<1x4xf32>
      %c0_18 = arith.constant 0 : index
      %c0_19 = arith.constant 0 : index
      %24 = vector.load %arg8[%c0_18, %c0_19] : memref<1x2xf32, #tpu.memory_space<vmem>>, vector<1x2xf32>
      %c0_20 = arith.constant 0 : index
      %c0_21 = arith.constant 0 : index
      %25 = vector.load %arg4[%c0_20, %c0_21] : memref<4x2xf32, #tpu.memory_space<vmem>>, vector<4x2xf32>
      %cst_22 = arith.constant dense<0.000000e+00> : vector<1x2xf32>
      %26 = tpu.matmul %23, %25, %cst_22 {dimension_numbers = #tpu.dot_dimension_numbers<[1], [0], [0], [1], [0, 0, 1, 1], [], []>} : vector<1x4xf32>, vector<4x2xf32>, vector<1x2xf32> -> vector<1x2xf32>
      %27 = arith.addf %24, %26 : vector<1x2xf32>
      %c0_23 = arith.constant 0 : index
      %c0_24 = arith.constant 0 : index
      %28 = vector.load %arg8[%c0_23, %c0_24] : memref<1x2xf32, #tpu.memory_space<vmem>>, vector<1x2xf32>
      tpu.vector_store %arg8[%c0_23, %c0_24], %27 {strides = array<i32>} : memref<1x2xf32, #tpu.memory_space<vmem>>, vector<1x2xf32>,
    } else {
    }
    %c0_i32_12 = arith.constant 0 : i32
    %16 = arith.cmpi eq, %arg1, %c0_i32_12 : i32
    %c0_i32_13 = arith.constant 0 : i32
    %17 = arith.cmpi eq, %arg2, %c0_i32_13 : i32
    %18 = arith.andi %16, %17 : i1
    %19 = arith.extui %18 : i1 to i32
    %c0_i32_14 = arith.constant 0 : i32
    %20 = arith.cmpi ne, %19, %c0_i32_14 : i32
    scf.if %20 {
      %c0_15 = arith.constant 0 : index
      %c0_16 = arith.constant 0 : index
      %21 = vector.load %arg8[%c0_15, %c0_16] : memref<1x2xf32, #tpu.memory_space<vmem>>, vector<1x2xf32>
      %cst_17 = arith.constant 0.000000e+00 : f32
      %22 = vector.broadcast %cst_17 : f32 to vector<1x2xf32>
      %23 = arith.maximumf %21, %22 : vector<1x2xf32>
      %c0_18 = arith.constant 0 : index
      %c0_19 = arith.constant 0 : index
      %24 = vector.load %arg5[%c0_18, %c0_19] : memref<2x4xf32, #tpu.memory_space<vmem>>, vector<2x4xf32>
      %cst_20 = arith.constant dense<0.000000e+00> : vector<1x4xf32>
      %25 = tpu.matmul %23, %24, %cst_20 {dimension_numbers = #tpu.dot_dimension_numbers<[1], [0], [0], [1], [0, 0, 1, 1], [], []>} : vector<1x2xf32>, vector<2x4xf32>, vector<1x4xf32> -> vector<1x4xf32>
      %26 = arith.negf %25 : vector<1x4xf32>
      %27 = math.exp %26 : vector<1x4xf32>
      %cst_21 = arith.constant 1.000000e+00 : f32
      %28 = vector.broadcast %cst_21 : f32 to vector<1x4xf32>
      %29 = arith.addf %28, %27 : vector<1x4xf32>
      %30 = arith.divf %28, %29 : vector<1x4xf32>
      %c0_22 = arith.constant 0 : index
      %c0_23 = arith.constant 0 : index
      %c0_24 = arith.constant 0 : index
      %31 = vector.load %arg6[%c0_22, %c0_23, %c0_24] : memref<1x1x4xf32, #tpu.memory_space<vmem>>, vector<1x1x4xf32>
      %32 = vector.shape_cast %31 : vector<1x1x4xf32> to vector<1x4xf32>
      %33 = vector.shape_cast %30 : vector<1x4xf32> to vector<1x1x4xf32>
      tpu.vector_store %arg6[%c0_22, %c0_23, %c0_24], %33 {strides = array<i32>} : memref<1x1x4xf32, #tpu.memory_space<vmem>>, vector<1x1x4xf32>,
    } else {
    }
    return
  }
  func.func @transform_0(%arg0: i32, %arg1: i32, %arg2: i32) -> (i32, i32, i32) {
    %c0_i32 = arith.constant 0 : i32
    return %arg0, %arg1, %arg2 : i32, i32, i32
  }
  func.func @transform_1(%arg0: i32, %arg1: i32, %arg2: i32) -> (i32, i32) {
    %c0_i32 = arith.constant 0 : i32
    %c0_i32_0 = arith.constant 0 : i32
    return %arg1, %c0_i32 : i32, i32
  }
  func.func @transform_2(%arg0: i32, %arg1: i32, %arg2: i32) -> (i32, i32) {
    %c0_i32 = arith.constant 0 : i32
    %c0_i32_0 = arith.constant 0 : i32
    %c0_i32_1 = arith.constant 0 : i32
    return %c0_i32, %c0_i32_0 : i32, i32
  }
  func.func @transform_3(%arg0: i32, %arg1: i32, %arg2: i32) -> (i32, i32, i32) {
    %c0_i32 = arith.constant 0 : i32
    %c0_i32_0 = arith.constant 0 : i32
    %c0_i32_1 = arith.constant 0 : i32
    return %arg0, %c0_i32, %c0_i32_0 : i32, i32, i32
  }
}

</mosaic_0001>

<bundles_post_ra>
// kernel: tpu_custom_call.1
= control target key start
LH: loop header
LB: loop body
LE: loop exit
PB: predicated region body
PF: predicated region fallthrough
CT: control target
= control target key end

     0   :  { %8 = vsyncpa [#allocation5], 0  ;;  %s1006_s0 = inlined_call_operand.hbm [shape: f32[2,4,256], index: 0, kind: input, shape index: {}]   ;;  %s1007_s1 = inlined_call_operand.vmem [shape: f32[4,2], index: 1, kind: input, shape index: {}]   ;;  %s1008_s2 = inlined_call_operand.vmem [shape: f32[2,4], index: 2, kind: input, shape index: {}]   ;;  %s1009_s3 = inlined_call_operand.hbm [shape: f32[2,1,4], index: 3, kind: output, shape index: {}]  }
   0x1   :  { %10 = vsyncpa [#allocation5 + $0x1], 0 }
   0x2   :  { %11 = vsyncpa [#allocation6], 0 }
   0x3   :  { %13 = vsyncpa [#allocation6 + $0x1], 0  ;;  %s851_s12 = smov 0   ;;  %s853_s13 = smov 0  }
   0x4   :  { %s855_s14 = smov 0   ;;  %s857_s15 = smov 0  }
   0x5   :  { %s859_s16 = smov 0   ;;  %s861_s17 = smov 0  }
   0x6 LB: > { %s610_s18 = sadd.s32 4294967295, %s823_s17   ;;  %s611_s19 = sadd.s32 4294967294, %s823_s17   ;;  %s823_s17 = sphi %s861_s17, %s19_s17   ;;  %s819_s16 = sphi %s859_s16, %s1021_s16   ;;  %s815_s15 = sphi %s857_s15, %s1020_s15   ;;  %s811_s14 = sphi %s855_s14, %s1019_s14   ;;  %s807_s13 = sphi %s853_s13, %s1018_s13   ;;  %s803_s12 = sphi %s851_s12, %s1017_s12  }
   0x7   : > { %s38_s20 = sadd.s32 1, %s819_s16  ;;  %s49_s21 = sadd.s32 1, %s811_s14 }
   0x8   : > { %p40_p0 = scmp.ge.s32.totalorder %s38_s20, 2  ;;  %p56_p1 = scmp.ne.s32.totalorder %s811_s14, %s807_s13 }
   0x9   : > { %p57_p2 = scmp.eq.s32.totalorder %s823_s17, 0  ;;  %p62_p3 = scmp.ne.s32.totalorder %s807_s13, %s803_s12 }
   0xa   : > { %s1023_s20 = smov (%p40_p0, %s38_s20), 0  ;;  %p63_p5 = scmp.eq.s32.totalorder %s610_s18, 0 }
   0xb   : > { %p892_p4 = por %p57_p2, %p56_p1  ;;  %s42_s23 = ssub.s32 %s819_s16, %s1023_s20 }
   0xc   : > { %p133_p6 = scmp.eq.s32.totalorder %s610_s18, 1  ;;  %p47_p7 = scmp.eq.s32.totalorder %s42_s23, 0 }
   0xd   : > { %p898_p8 = por %p63_p5, %p62_p3  ;;  %p139_p10 = scmp.eq.s32.totalorder %s611_s19, 1 }
   0xe   : > { %p902_p9 = por %p133_p6, %p56_p1  ;;  %p655_p13 = scmp.lt.s32.totalorder %s823_s17, 2 }
   0xf   : > { %s907_s26 = scalar_select %p47_p7, %s811_s14, %s49_s21  }
  0x10   : > { %p909_p11 = por %p139_p10, %p62_p3  ;;  %s169_s28 = sand.u32 1, %s811_s14  }
  0x11   : > { %s615_s29 = sshll.u32 %s169_s28, 3  ;;  %s628_s30 = sshll.u32 %s819_s16, 7 }
  0x12   : > { %s1013_s27 = scalar_select %p909_p11, 1, 0 }
  0x13   : > { %s183_s6 = scalar_lea.hbm %s1006_s0, %s628_s30  ;;  %s173_s7 = scalar_lea.vmem [#allocation4], %s615_s29 }
  0x14   : > { %s185_s8 = sshll.u32 %s173_s7, 4  ;;  %p922_p0 = pnand %p655_p13, %p892_p4  ;;  %s186_s8 = int_to_ptr.vmem [resolvable:$true] %s185_s8 }
  0x15   : > { %p618_p1 = scmp.ge.s32.totalorder %s823_s17, 1  ;;  %p190_p2 = scmp.lt.s32.totalorder %s823_s17, 3 }
  0x16   : > { %s170_s10 = scalar_lea.sflag [#allocation5], %s169_s28  ;;  %p717_p3 = pneg %p922_p0 }
  0x17   : > { %s728_s11 = scalar_lea.vmem %s186_s8, 128  ;;  %s825_s18 = smov [#allocation4]  }
  0x18   : > { %p729_p5 = scmp.ne.s32.totalorder %s186_s8, %s728_s11  ;;  %s733_s19 = sshll.u32 %s825_s18, 4  ;;  %s734_s19 = int_to_ptr.vmem [resolvable:$false] %s733_s19 }
  0x19   : > { %s735_s21 = scalar_lea.vmem %s734_s19, 256  ;;  %p736_p10 = scmp.lt.s32.totalorder %s186_s8, %s734_s19 }
  0x1a   : > { %p731_p6 = pnand %p729_p5, %p717_p3  ;;  %p737_p12 = scmp.lt.s32.totalorder %s735_s21, %s728_s11 }
  0x1c   : > { %p732_p7 = pneg %p731_p6  ;;  %p738_p4 = por %p737_p12, %p736_p10 }
  0x1e   : > { %p739_p13 = pnand %p738_p4, %p732_p7 }
  0x20   : > { %742 = shalt.err (!%p739_p13)
}
  0x21   : > { %650 = dma.hbm_to_vmem [thread:$0]  (!%p922_p0), %s183_s6, 128, %s186_s8, %s170_s10  }
  0x22   : > { %p191_p11 = pnand %p618_p1, %p190_p2 }
  0x23   : > { %s937_s22 = sand.u32 (!%p191_p11), 1, %s807_s13  }
  0x24   : > { %194 = sbr.rel (%p191_p11) target bundleno = 781 (0x30d), region = 32  ;;  %s619_s23 = sshll.u32 (!%p191_p11), %s937_s22, 3 }
  0x25   : > { %s197_s28 = scalar_lea.sflag (!%p191_p11), [#allocation5], %s937_s22  ;;  %s200_s29 = scalar_lea.vmem (!%p191_p11), [#allocation4], %s619_s23 }
  0x29   : > { %794 = dma.done.wait (%p898_p8), %s197_s28, 128  }
  0x2a   : > { %796 = vsyncadd (%p898_p8), %s197_s28, 4294967168  ;;  %vm249_vm0 = vcmask 1043456   ;;  %v245_v0 = vld [vmem:[%s200_s29] sm:$0xff]  ;;  %v826_v5 = vmov 0   ;;  %v256_v6 = vlaneseq  ;;  %vm242_vm1 = vcmask 24576   ;;  %s625_s6 = sshll.u32 %s815_s15, 4 }
  0x2b   : > { %v247_v1 = vcombine.high %v245_v0, %v245_v0  ;;  %v250_v2 = vsel %vm249_vm0, %v245_v0, 0.0  ;;  %709 = vset.pattern.permute.xlu0 %v826_v5  ;;  %v827_v9 = vmov 0.0   ;;  %v828_v11 = vmov 1966171168   ;;  %v329_v30 = vld [vmem:[%s1007_s1] sm:$0xf]  ;;  %s963_s11 = scalar_lea.hbm %s1009_s3, %s625_s6 }
  0x2c   : > { %v257_v7 = vshrl.u32 %v256_v6, 7  ;;  %v300_v8 = vand.u32 127, %v256_v6  ;;  %243 = vst.msk [vmem:[#allocation2] sm:$0x1] %vm242_vm1, %v827_v9  ;;  %633 = vmatprep.subr.mxu0 %v827_v9  ;;  %638 = vmatprep.subr.mxu1 %v827_v9  ;;  %v275_v12 = vunpack.c.l.s4 %v828_v11  ;;  %vm829_vm2 = vmmov 0   ;;  %s225_s7 = scalar_lea.vmem [#allocation7], %s937_s22 }
  0x2d   : > { %v251_v3 = vsel %vm249_vm0, %v247_v1, 0.0  ;;  %634 = vmatpush3.msk.msra.mxu0 %vm249_vm0, %v329_v30  ;;  %635 = vmatprep.mubr.msk.f32.mxu0 %vm829_vm2, %v827_v9  ;;  %vm237_vm3 = vcmask 8192   ;;  %vm330_vm4 = vcmask 31744   ;;  %v414_v39 = vld [vmem:[%s1008_s2] sm:$0x3]  ;;  %vm419_vm5 = vcmask 1041408  }
  0x2e   : > { %v252_v4 = vadd.f32 %v251_v3, %v250_v2  ;;  %v303_v10 = vsub.s32 %v300_v8, %v257_v7  ;;  %v276_v13 = vunpack.c.0.s8 %v275_v12  ;;  %v258_v14 = vsub.s32 0, %v257_v7  ;;  %640 = vmatprep.mubr.msk.f32.mxu1 %vm829_vm2, %v827_v9  ;;  %238 = vst.msk [vmem:[#allocation3] sm:$0x1] %vm237_vm3, %v827_v9  ;;  %639 = vmatpush3.msk.msra.mxu1 %vm419_vm5, %v414_v39  ;;  %s513_s8 = sshll.u32 %s225_s7, 4  ;;  %s501_s18 = scalar_lea.sflag [#allocation6], %s937_s22  ;;  %s514_s8 = int_to_ptr.vmem [resolvable:$true] %s513_s8 }
  0x2f   : > { %v262_v15 = vsub.s32 1, %v257_v7  ;;  %v266_v16 = vsub.s32 2, %v257_v7  ;;  %v270_v17 = vsub.s32 3, %v257_v7  ;;  %vm415_vm6 = vcmask 15360   ;;  %s743_s19 = scalar_lea.vmem %s514_s8, 16  ;;  %s830_s21 = smov [#allocation7]  }
  0x30   : > { %253 = vadd.xlane.f32.xlu0 %v252_v4  ;;  %v279_v19 = vsub.s32 %v276_v13, %v257_v7  ;;  %p744_p8 = scmp.ne.s32.totalorder %s514_s8, %s743_s19  ;;  %s747_s23 = sshll.u32 %s830_s21, 4  ;;  %s748_s23 = int_to_ptr.vmem [resolvable:$false] %s747_s23 }
  0x31   : > { %s749_s15 = scalar_lea.vmem %s748_s23, 32  ;;  %p750_p0 = scmp.lt.s32.totalorder %s514_s8, %s748_s23 }
  0x32   : > { %p745_p11 = pnand %p744_p8, %p902_p9  ;;  %p751_p1 = scmp.lt.s32.totalorder %s749_s15, %s743_s19 }
  0x33   : > { %v244_v34 = vld [vmem:[#allocation2] sm:$0x1] }
  0x34   : > { %p746_p12 = pneg %p745_p11  ;;  %p752_p2 = por %p751_p1, %p750_p0 }
  0x35   : > { %v328_v40 = vld [vmem:[#allocation3] sm:$0x1] }
  0x36   : > { %p753_p3 = pnand %p752_p2, %p746_p12 }
  0xb9   : > { %v254_v18 = vpop.xlane.xlu0 %253 }
  0xba   : > { %v259_v20 = vrot.slane %v254_v18, %v258_v14  ;;  %v263_v21 = vrot.slane %v254_v18, %v262_v15  ;;  %v267_v22 = vrot.slane %v254_v18, %v266_v16  ;;  %v271_v23 = vrot.slane %v254_v18, %v270_v17 }
  0xbc   : > { %v272_v24 = vcombine.low %v259_v20, %v263_v21  ;;  %v273_v25 = vcombine.low %v267_v22, %v271_v23 }
  0xbe   : > { %v280_v26 = vrot.slane %v272_v24, %v279_v19  ;;  %v287_v27 = vrot.slane %v273_v25, %v279_v19 }
  0xc0   : > { %v288_v28 = vcombine.low %v280_v26, %v287_v27 }
  0xc2   : > { %v295_v29 = vrot.slane %v288_v28, %v279_v19 }
  0xc4   : > { %297 = vperm.xlu0 %709, %v295_v29  }
 0x13f   : > { %v298_v31 = vpop.permute.xlu0 %297 }
 0x140   : > { %v304_v32 = vrot.slane %v298_v31, %v303_v10 }
 0x142   : > { %v311_v33 = vrot.slane %v304_v32, %v279_v19 }
 0x144   : > { %v318_v35 = vrot.slane %v311_v33, %v279_v19 }
 0x146   : > { %v320_v36 = vadd.f32 %v318_v35, %v244_v34 }
 0x148   : > { %322 = vst.msk [vmem:[#allocation2] sm:$0x1] %vm242_vm1, %v320_v36 }
 0x14f   : > { %v326_v37 = vld [vmem:[#allocation2] sm:$0x1] }
 0x150   : > { %v327_v38 = vmul.f32 0.00390625, %v326_v37 }
 0x152   : > { %636 = vmatmul.mubr.msk.f32.vlgmr.msra.gmra.mxu0 %vm330_vm4, %v327_v38 }
 0x212   : > { %v403_v41 = vpop.f32.mrf.mxu0 }
 0x213   : > { %v407_v42 = vadd.f32 %v403_v41, %v328_v40 }
 0x214   : > { %v637_v43 = vpop.f32.mrf.mxu0 }
 0x215   : > { %409 = vst.msk [vmem:[#allocation3] sm:$0x1] %vm237_vm3, %v407_v42 }
 0x21c   : > { %v412_v44 = vld [vmem:[#allocation3] sm:$0x1] }
 0x21d   : > { %v413_v45 = vmax.f32 %v412_v44, 0.0 }
 0x21f   : > { %641 = vmatmul.mubr.msk.f32.vlgmr.msra.gmra.mxu1 %vm415_vm6, %v413_v45 }
 0x2df   : > { %v489_v46 = vpop.f32.mrf.mxu1 }
 0x2e0   : > { %v624_v47 = vmul.f32 -1.442695, %v489_v46 }
 0x2e1   : > { %v642_v48 = vpop.f32.mrf.mxu1 }
 0x2e2   : > { %711 = vpow2.f32 %v624_v47 }
 0x2ef   : > { %v712_v49 = vpop.eup %711 }
 0x2f0   : > { %v496_v50 = vadd.f32 1.0, %v712_v49 }
 0x2f2   : > { %713 = vrcp.f32 %v496_v50 }
 0x2ff   : > { %v714_v51 = vpop.eup %713 }
 0x300   : > { %499 = vst.msk [vmem:[%s225_s7] sm:$0x1] %vm242_vm1, %v714_v51 }
 0x301   : > { %756 = shalt.err (!%p753_p3)
}
 0x302   : > { %s757_s28 = scalar_lea.hbm %s963_s11, 16  ;;  %s761_s24 = scalar_lea.hbm %s1009_s3, 32 }
 0x303   : > { %p758_p5 = scmp.ne.s32.totalorder %s963_s11, %s757_s28  ;;  %p762_p10 = scmp.lt.s32.totalorder %s963_s11, %s1009_s3 }
 0x304   : > { %p763_p4 = scmp.lt.s32.totalorder %s761_s24, %s757_s28 }
 0x305   : > { %p759_p6 = pnand %p758_p5, %p902_p9 }
 0x306   : > { %p764_p13 = por %p763_p4, %p762_p10 }
 0x307   : > { %p760_p7 = pneg %p759_p6 }
 0x309   : > { %p765_p8 = pnand %p764_p13, %p760_p7 }
 0x30b   : > { %768 = shalt.err (!%p765_p8)
}
 0x30c   : > { %645 = dma.vmem_to_hbm [thread:$0]  (%p902_p9), %s514_s8, 16, %s963_s11, %s501_s18  }
 0x30d PF: > { %s525_s5 = sand.u32 1, %s803_s12   ;;  %p1015_p11 = scmp.ne.s32.totalorder %s1013_s27, 0 }
 0x30e   : > { %p1016_p12 = scmp.ge.s32.totalorder %s823_s17, 2  ;;  %s526_s6 = scalar_lea.sflag [#allocation6], %s525_s5 }
 0x310   : > { %p652_p0 = pnand %p1016_p12, %p1015_p11 }
 0x312   : > { %p653_p1 = pneg %p652_p0 }
 0x314   : > { %798 = dma.done.wait (%p653_p1), %s526_s6, 16  }
 0x315   : > { %800 = vsyncadd (%p653_p1), %s526_s6, 4294967280  ;;  %s19_s17 = sadd.s32 1, %s823_s17   ;;  %s1017_s12 = smov %s807_s13 }
 0x316   : > { %p16_p2 = scmp.ge.s32.totalorder %s19_s17, 4   ;;  %s1018_s13 = smov %s811_s14 }
 0x317   : > { %s1019_s14 = smov %s907_s26  ;;  %s1020_s15 = smov %s819_s16 }
 0x318   : > { %s1021_s16 = smov %s1023_s20  ;;  %18 = sbr.rel (!%p16_p2) target bundleno = 6 (0x6), region = 96 }
 0x31d   :  { %530 = vsyncpa [#allocation5], 1 }
 0x31e   :  { %532 = vsyncpa [#allocation5 + $0x1], 1 }
 0x31f   :  { %533 = vsyncpa [#allocation6], 1 }
 0x320   :  { %535 = vsyncpa [#allocation6 + $0x1], 1 }

</bundles_post_ra>
